<compile_context>
chip_gen: v5e
topology: v5e:2x2
jax: 0.10.0
libtpu: 0.0.40
codegen_flags: <defaults>
</compile_context>

<pallas_src>
import jax
import jax.numpy as jnp
from jax.experimental import pallas as pl
from jax.experimental.pallas import tpu as pltpu


# ----------------------------------------------------------------------------
# Helpers
# ----------------------------------------------------------------------------
def _round_up(x, m):
    return ((x + m - 1) // m) * m


# ----------------------------------------------------------------------------
# Pallas kernel (fused _Initial_part forward, generic number of Linear layers)
# ----------------------------------------------------------------------------
def _make_mlp_kernel(n_layers, compute_dtype):
    """Fused Linear(+ReLU) ... Linear. refs = (x, w1, b1, ..., wN, bN, out)."""

    def kernel(*refs):
        x_ref = refs[0]
        o_ref = refs[-1]
        wb = refs[1:-1]

        # f32 HBM tile -> bf16 in-register: no extra wrapper-side HBM pass.
        h = x_ref[...].astype(compute_dtype)
        for li in range(n_layers):
            w_ref = wb[2 * li]
            b_ref = wb[2 * li + 1]
            # MXU matmul with f32 accumulation; bias/ReLU epilogue in f32 (v5e-safe).
            acc = jnp.dot(h, w_ref[...], preferred_element_type=jnp.float32)
            acc = acc + b_ref[...]                      # (1, N) f32 bias broadcast
            if li + 1 < n_layers:
                h = jnp.maximum(acc, 0.0).astype(compute_dtype)   # nn.ReLU()
            else:
                h = acc
        o_ref[...] = h.astype(o_ref.dtype)              # logical-width store

    return kernel


# ----------------------------------------------------------------------------
# Grid choice: big 16-aligned batch tiles; even >=2 blocks for large batches (v7x)
# ----------------------------------------------------------------------------
def _choose_batch_grid(batch, max_tile_b, *, align=16, min_rows_per_core=2048):
    target = pl.cdiv(batch, max_tile_b)
    # v7x megacore: for large batches force >=2 blocks and an even count so both
    # TensorCores get equal work on the "parallel" axis. Harmless on 1-TC chips.
    if batch >= 2 * min_rows_per_core:
        target = max(target, 2)
    if target > 1 and target % 2:
        target += 1
    if target <= 1:
        # One block == full array along batch: no alignment / masking needed at all.
        return batch, 1
    tile_b = _round_up(pl.cdiv(batch, target), align)   # 16-aligned (bf16 sublanes)
    return tile_b, pl.cdiv(batch, tile_b)               # ragged last block is masked


# ----------------------------------------------------------------------------
# Wrapper: batch-tiled pallas_call
# ----------------------------------------------------------------------------
def mlp_forward(h, kernel_params, target_dim, *,
                compute_dtype=jnp.bfloat16, max_tile_b=8192):
    """h: (B, in_dim) f32. kernel_params: [w1, b1, ...] (W compute_dtype, b f32)."""
    h = h.astype(jnp.float32)
    batch, in_dim = h.shape
    n_layers = len(kernel_params) // 2
    tile_b, nblocks = _choose_batch_grid(batch, max_tile_b)

    in_specs = [pl.BlockSpec((tile_b, in_dim), lambda i: (i, 0))]
    for p in kernel_params:
        # Constant index_map -> weights/biases DMA'd once, VMEM-resident across the
        # whole grid.  (pl.Buffered(1) would also drop the second buffer; negligible
        # at these weight sizes, so skipped to keep lowering maximally portable.)
        in_specs.append(pl.BlockSpec(p.shape, lambda i: (0, 0)))
    # Last dim == full array dim (target_dim): legal block, no padded writeback,
    # no wrapper-side slice pass.
    out_spec = pl.BlockSpec((tile_b, target_dim), lambda i: (i, 0))

    flops = 2 * batch * sum(
        int(kernel_params[2 * l].shape[0] * kernel_params[2 * l].shape[1])
        for l in range(n_layers))
    bytes_accessed = int(
        batch * in_dim * 4                                            # f32 input read
        + sum(int(p.size * p.dtype.itemsize) for p in kernel_params)  # params (once)
        + batch * target_dim * 4)                                     # f32 output write

    return pl.pallas_call(
        _make_mlp_kernel(n_layers, compute_dtype),
        out_shape=jax.ShapeDtypeStruct((batch, target_dim), jnp.float32),
        grid=(nblocks,),
        in_specs=in_specs,
        out_specs=out_spec,
        compiler_params=pltpu.CompilerParams(
            dimension_semantics=("parallel",),     # batch grid shards over v7x's 2 TCs
            vmem_limit_bytes=32 * 1024 * 1024,     # explicit; far above this kernel's need
        ),
        cost_estimate=pl.CostEstimate(
            flops=flops, transcendentals=0, bytes_accessed=bytes_accessed),
    )(h, *kernel_params)


# ----------------------------------------------------------------------------
# Module port
# ----------------------------------------------------------------------------
class InitialPallas:
    """JAX/Pallas port of `_Initial` (dropout=None, eval semantics)."""

    def __init__(self, data_dim, logsig_dim, emb_dim, target_dim, layers_dim,
                 layer_type, key, *, compute_dtype=jnp.bfloat16, max_tile_b=8192):
        self.layer_type = layer_type
        self.target_dim = target_dim
        self.compute_dtype = compute_dtype
        self.max_tile_b = max_tile_b

        if layer_type == "learnable":
            self.learnable = True
            # nn.Parameter(torch.ones(target_dim) * 0.1)
            self.param = jnp.full((target_dim,), 0.1, dtype=jnp.float32)
            return

        self.learnable = False
        layer_t, self.input_t = layer_type.split("_")
        if self.input_t == "logsig":
            input_dim = logsig_dim
        elif self.input_t == "emb":
            input_dim = emb_dim
        elif self.input_t == "x":
            input_dim = data_dim
        else:
            raise ValueError(f"unknown layer_type {layer_type!r}")

        self.is_fc = (layer_t == "fc")
        if not self.is_fc:
            return  # identity layer (`lambda x: x`)

        # _Initial_part dim bookkeeping (supports any len(layers_dim) >= 0).
        dims = [input_dim]
        for factor in layers_dim:
            nd = factor if isinstance(factor, int) else max(int(factor * target_dim), 10)
            dims.append(nd)
        dims.append(target_dim)
        n_layers = len(dims) - 1

        # Deterministic synthetic init, stored (in, out) so y = x @ W + b matches
        # torch's y = x @ W_t.T + b with W_t = W.T.  No feature-dim padding.
        ks = jax.random.split(key, 2 * n_layers)
        self.params_logical = []   # f32 "truth" for the reference
        self.params_kernel = []    # logical sizes; W in compute_dtype, b in f32
        for i in range(n_layers):
            fan_in, fan_out = dims[i], dims[i + 1]
            bound = 1.0 / (fan_in ** 0.5)
            w = jax.random.uniform(ks[2 * i], (fan_in, fan_out), jnp.float32, -bound, bound)
            b = jax.random.uniform(ks[2 * i + 1], (1, fan_out), jnp.float32, -bound, bound)
            self.params_logical += [w, b]
            self.params_kernel += [w.astype(compute_dtype), b]

    def __call__(self, x, logsig=None, emb=None):
        if self.learnable:
            # (B, target_dim) broadcast: not worth a pallas_call; XLA fuses it.
            return jnp.broadcast_to(self.param, (x.shape[0], self.target_dim))
        h = {"logsig": logsig, "emb": emb, "x": x}[self.input_t]
        if not self.is_fc:
            return h
        return mlp_forward(h, self.params_kernel, self.target_dim,
                           compute_dtype=self.compute_dtype,
                           max_tile_b=self.max_tile_b)


# ----------------------------------------------------------------------------
# Reference (plain JAX) for verification
# ----------------------------------------------------------------------------
def _mlp_ref(h, params_logical, compute_dtype=jnp.float32):
    n = len(params_logical) // 2
    x = h.astype(compute_dtype)
    for i in range(n):
        w = params_logical[2 * i].astype(compute_dtype)
        b = params_logical[2 * i + 1]
        x = jnp.dot(x, w, preferred_element_type=jnp.float32) + b
        if i + 1 < n:
            x = jnp.maximum(x, 0.0).astype(compute_dtype)
    return x


if __name__ == "__main__":
    key = jax.random.PRNGKey(0)
    k_x, k_logsig, k_emb, k_p1, k_p2, k_big = jax.random.split(key, 6)

    # Small, module-consistent shapes.
    batch = 8
    data_dim, logsig_dim, emb_dim = 32, 24, 16
    target_dim = 16
    layers_dim = [2.0, 1.0]   # hidden dims: max(int(2*16),10)=32, max(int(1*16),10)=16

    x = jax.random.normal(k_x, (batch, data_dim), jnp.float32)
    logsig = jax.random.normal(k_logsig, (batch, logsig_dim), jnp.float32)
    emb = jax.random.normal(k_emb, (batch, emb_dim), jnp.float32)

    # --- fc_x branch: fused, single-block, bf16-compute Pallas MLP ---
    mod_fc = InitialPallas(data_dim, logsig_dim, emb_dim, target_dim,
                           layers_dim, "fc_x", k_p1)
    out_fc = mod_fc(x, logsig=logsig, emb=emb)
    jax.block_until_ready(out_fc)
    assert out_fc.shape == (batch, target_dim)
    ref_bf16 = _mlp_ref(x, mod_fc.params_logical, jnp.bfloat16)   # same cast points
    ref_f32 = _mlp_ref(x, mod_fc.params_logical, jnp.float32)     # math sanity
    assert jnp.allclose(out_fc, ref_bf16, atol=3e-3, rtol=3e-3), "bf16-matched ref mismatch"
    assert jnp.allclose(out_fc, ref_f32, atol=1e-1, rtol=1e-1), "f32 math ref mismatch"

    # --- fc_logsig branch: multi-block grid with ragged (masked) final block:
    #     B=300, tile cap 128 -> 3 blocks, evened to 4 -> tile_b=80, last block masked.
    big_batch = 300
    logsig_big = jax.random.normal(k_big, (big_batch, logsig_dim), jnp.float32)
    x_big = jnp.zeros((big_batch, data_dim), jnp.float32)   # only used for len(x)
    mod_fc2 = InitialPallas(data_dim, logsig_dim, emb_dim, target_dim,
                            layers_dim, "fc_logsig", k_p2, max_tile_b=128)
    out_big = mod_fc2(x_big, logsig=logsig_big)
    jax.block_until_ready(out_big)
    assert out_big.shape == (big_batch, target_dim)
    ref_big = _mlp_ref(logsig_big, mod_fc2.params_logical, jnp.bfloat16)
    assert jnp.allclose(out_big, ref_big, atol=3e-3, rtol=3e-3), "multi-block mismatch"

    # --- learnable branch (plain broadcast, per perf review) ---
    mod_learn = InitialPallas(data_dim, logsig_dim, emb_dim, target_dim,
                              layers_dim, "learnable", k_p1)
    out_learn = mod_learn(x)
    jax.block_until_ready(out_learn)
    assert out_learn.shape == (batch, target_dim)
    assert jnp.allclose(out_learn, jnp.full((batch, target_dim), 0.1), atol=1e-7)

    # --- no_emb branch (identity) ---
    mod_no = InitialPallas(data_dim, logsig_dim, emb_dim, target_dim,
                           layers_dim, "no_emb", k_p1)
    out_no = mod_no(x, logsig=logsig, emb=emb)
    assert jnp.allclose(out_no, emb)

    # TODO(synk): nn.Dropout path omitted (module is built with dropout=None; eval-mode identity).
    print("KERNEL_OK")
</pallas_src>

<mosaic_0001>
module attributes {stable_mosaic.version = 11 : i64} {
  func.func @kernel(%arg0: i32, %arg1: memref<8x32xf32, #tpu.memory_space<vmem>>, %arg2: memref<32x32xbf16, #tpu.memory_space<vmem>>, %arg3: memref<1x32xf32, #tpu.memory_space<vmem>>, %arg4: memref<32x16xbf16, #tpu.memory_space<vmem>>, %arg5: memref<1x16xf32, #tpu.memory_space<vmem>>, %arg6: memref<16x16xbf16, #tpu.memory_space<vmem>>, %arg7: memref<1x16xf32, #tpu.memory_space<vmem>>, %arg8: memref<8x16xf32, #tpu.memory_space<vmem>>) attributes {dimension_semantics = [#tpu.dimension_semantics<parallel>], iteration_bounds = array<i64: 1>, scalar_prefetch = 0 : i64, scratch_operands = 0 : i64, tpu.core_type = #tpu.core_type<tc>, window_params = [{transform_indices = @transform_0, window_bounds = array<i64: 8, 32>}, {pipeline_mode = #tpu.pipeline_mode<synchronous>, transform_indices = @transform_1, window_bounds = array<i64: 32, 32>}, {pipeline_mode = #tpu.pipeline_mode<synchronous>, transform_indices = @transform_2, window_bounds = array<i64: 1, 32>}, {pipeline_mode = #tpu.pipeline_mode<synchronous>, transform_indices = @transform_3, window_bounds = array<i64: 32, 16>}, {pipeline_mode = #tpu.pipeline_mode<synchronous>, transform_indices = @transform_4, window_bounds = array<i64: 1, 16>}, {pipeline_mode = #tpu.pipeline_mode<synchronous>, transform_indices = @transform_5, window_bounds = array<i64: 16, 16>}, {pipeline_mode = #tpu.pipeline_mode<synchronous>, transform_indices = @transform_6, window_bounds = array<i64: 1, 16>}, {transform_indices = @transform_7, window_bounds = array<i64: 8, 16>}]} {
    %c0 = arith.constant 0 : index
    %c0_0 = arith.constant 0 : index
    %0 = vector.load %arg1[%c0, %c0_0] : memref<8x32xf32, #tpu.memory_space<vmem>>, vector<8x32xf32>
    %1 = arith.truncf %0 : vector<8x32xf32> to vector<8x32xbf16>
    %c0_1 = arith.constant 0 : index
    %c0_2 = arith.constant 0 : index
    %2 = vector.load %arg2[%c0_1, %c0_2] : memref<32x32xbf16, #tpu.memory_space<vmem>>, vector<32x32xbf16>
    %cst = arith.constant dense<0.000000e+00> : vector<8x32xf32>
    %3 = tpu.matmul %1, %2, %cst {dimension_numbers = #tpu.dot_dimension_numbers<[1], [0], [0], [1], [0, 0, 1, 1], [], []>} : vector<8x32xbf16>, vector<32x32xbf16>, vector<8x32xf32> -> vector<8x32xf32>
    %c0_3 = arith.constant 0 : index
    %c0_4 = arith.constant 0 : index
    %4 = vector.load %arg3[%c0_3, %c0_4] : memref<1x32xf32, #tpu.memory_space<vmem>>, vector<1x32xf32>
    %5 = vector.broadcast %4 : vector<1x32xf32> to vector<8x32xf32>
    %6 = arith.addf %3, %5 : vector<8x32xf32>
    %cst_5 = arith.constant 0.000000e+00 : f32
    %7 = vector.broadcast %cst_5 : f32 to vector<8x32xf32>
    %8 = arith.maximumf %6, %7 : vector<8x32xf32>
    %9 = arith.truncf %8 : vector<8x32xf32> to vector<8x32xbf16>
    %c0_6 = arith.constant 0 : index
    %c0_7 = arith.constant 0 : index
    %10 = vector.load %arg4[%c0_6, %c0_7] : memref<32x16xbf16, #tpu.memory_space<vmem>>, vector<32x16xbf16>
    %cst_8 = arith.constant dense<0.000000e+00> : vector<8x16xf32>
    %11 = tpu.matmul %9, %10, %cst_8 {dimension_numbers = #tpu.dot_dimension_numbers<[1], [0], [0], [1], [0, 0, 1, 1], [], []>} : vector<8x32xbf16>, vector<32x16xbf16>, vector<8x16xf32> -> vector<8x16xf32>
    %c0_9 = arith.constant 0 : index
    %c0_10 = arith.constant 0 : index
    %12 = vector.load %arg5[%c0_9, %c0_10] : memref<1x16xf32, #tpu.memory_space<vmem>>, vector<1x16xf32>
    %13 = vector.broadcast %12 : vector<1x16xf32> to vector<8x16xf32>
    %14 = arith.addf %11, %13 : vector<8x16xf32>
    %cst_11 = arith.constant 0.000000e+00 : f32
    %15 = vector.broadcast %cst_11 : f32 to vector<8x16xf32>
    %16 = arith.maximumf %14, %15 : vector<8x16xf32>
    %17 = arith.truncf %16 : vector<8x16xf32> to vector<8x16xbf16>
    %c0_12 = arith.constant 0 : index
    %c0_13 = arith.constant 0 : index
    %18 = vector.load %arg6[%c0_12, %c0_13] : memref<16x16xbf16, #tpu.memory_space<vmem>>, vector<16x16xbf16>
    %cst_14 = arith.constant dense<0.000000e+00> : vector<8x16xf32>
    %19 = tpu.matmul %17, %18, %cst_14 {dimension_numbers = #tpu.dot_dimension_numbers<[1], [0], [0], [1], [0, 0, 1, 1], [], []>} : vector<8x16xbf16>, vector<16x16xbf16>, vector<8x16xf32> -> vector<8x16xf32>
    %c0_15 = arith.constant 0 : index
    %c0_16 = arith.constant 0 : index
    %20 = vector.load %arg7[%c0_15, %c0_16] : memref<1x16xf32, #tpu.memory_space<vmem>>, vector<1x16xf32>
    %21 = vector.broadcast %20 : vector<1x16xf32> to vector<8x16xf32>
    %22 = arith.addf %19, %21 : vector<8x16xf32>
    %c0_17 = arith.constant 0 : index
    %c0_18 = arith.constant 0 : index
    %23 = vector.load %arg8[%c0_17, %c0_18] : memref<8x16xf32, #tpu.memory_space<vmem>>, vector<8x16xf32>
    tpu.vector_store %arg8[%c0_17, %c0_18], %22 {strides = array<i32>} : memref<8x16xf32, #tpu.memory_space<vmem>>, vector<8x16xf32>,
    return
  }
  func.func @transform_0(%arg0: i32) -> (i32, i32) {
    %c0_i32 = arith.constant 0 : i32
    %c0_i32_0 = arith.constant 0 : i32
    return %arg0, %c0_i32 : i32, i32
  }
  func.func @transform_1(%arg0: i32) -> (i32, i32) {
    %c0_i32 = arith.constant 0 : i32
    %c0_i32_0 = arith.constant 0 : i32
    %c0_i32_1 = arith.constant 0 : i32
    return %c0_i32, %c0_i32_0 : i32, i32
  }
  func.func @transform_2(%arg0: i32) -> (i32, i32) {
    %c0_i32 = arith.constant 0 : i32
    %c0_i32_0 = arith.constant 0 : i32
    %c0_i32_1 = arith.constant 0 : i32
    return %c0_i32, %c0_i32_0 : i32, i32
  }
  func.func @transform_3(%arg0: i32) -> (i32, i32) {
    %c0_i32 = arith.constant 0 : i32
    %c0_i32_0 = arith.constant 0 : i32
    %c0_i32_1 = arith.constant 0 : i32
    return %c0_i32, %c0_i32_0 : i32, i32
  }
  func.func @transform_4(%arg0: i32) -> (i32, i32) {
    %c0_i32 = arith.constant 0 : i32
    %c0_i32_0 = arith.constant 0 : i32
    %c0_i32_1 = arith.constant 0 : i32
    return %c0_i32, %c0_i32_0 : i32, i32
  }
  func.func @transform_5(%arg0: i32) -> (i32, i32) {
    %c0_i32 = arith.constant 0 : i32
    %c0_i32_0 = arith.constant 0 : i32
    %c0_i32_1 = arith.constant 0 : i32
    return %c0_i32, %c0_i32_0 : i32, i32
  }
  func.func @transform_6(%arg0: i32) -> (i32, i32) {
    %c0_i32 = arith.constant 0 : i32
    %c0_i32_0 = arith.constant 0 : i32
    %c0_i32_1 = arith.constant 0 : i32
    return %c0_i32, %c0_i32_0 : i32, i32
  }
  func.func @transform_7(%arg0: i32) -> (i32, i32) {
    %c0_i32 = arith.constant 0 : i32
    %c0_i32_0 = arith.constant 0 : i32
    return %arg0, %c0_i32 : i32, i32
  }
}

</mosaic_0001>

<bundles_post_ra>
// kernel: tpu_custom_call.1
= control target key start
LH: loop header
LB: loop body
LE: loop exit
PB: predicated region body
PF: predicated region fallthrough
CT: control target
= control target key end

     0   :  { %12 = vsyncpa [#allocation3], 0  ;;  %s331_s0 = inlined_call_operand.vmem [shape: f32[8,32], index: 0, kind: input, shape index: {}]   ;;  %s332_s1 = inlined_call_operand.vmem [shape: bf16[32,32], index: 1, kind: input, shape index: {}]   ;;  %s333_s2 = inlined_call_operand.vmem [shape: f32[1,32], index: 2, kind: input, shape index: {}]   ;;  %s334_s3 = inlined_call_operand.vmem [shape: bf16[32,16], index: 3, kind: input, shape index: {}]   ;;  %s335_s4 = inlined_call_operand.vmem [shape: f32[1,16], index: 4, kind: input, shape index: {}]   ;;  %s336_s5 = inlined_call_operand.hbm [shape: bf16[16,16], index: 5, kind: input, shape index: {}]   ;;  %s337_s6 = inlined_call_operand.vmem [shape: f32[1,16], index: 6, kind: input, shape index: {}]   ;;  %s338_s7 = inlined_call_operand.hbm [shape: f32[8,16], index: 7, kind: output, shape index: {}]  }
   0x1   :  { %13 = vsyncpa [#allocation4], 0  ;;  %s28_s26 = sshll.u32 %s336_s5, 4  ;;  %s257_s27 = smov [#allocation2]   ;;  %s29_s26 = int_to_ptr.hbm [resolvable:$true] %s28_s26 }
   0x2   :  { %s30_s28 = sshll.u32 %s257_s27, 4  ;;  %s258_s29 = smov 64   ;;  %s31_s28 = int_to_ptr.vmem [resolvable:$true] %s30_s28 }
   0x3   :  { %s259_s30 = smov 4  }
   0x4   :  { %36 = dma.hbm_to_vmem [thread:$0]  %s29_s26, 128, %s31_s28, [#allocation3], %s258_s29, %s258_s29, %s259_s30  }
   0x5   :  { %253 = dma.done.wait [#allocation3], 128  }
   0x6   :  { %254 = vsyncadd [#allocation3], 4294967168  ;;  %v194_v0 = vld [vmem:[%s332_s1 + $0x8] sm:$0xff]  ;;  %v193_v1 = vld [vmem:[%s332_s1] sm:$0xff]  ;;  %vm66_vm0 = vcmask 261120   ;;  %vm135_vm1 = vcmask 130048  }
   0x7   :  { %76 = vmatpush.bf16.msra.mxu0 %v194_v0  ;;  %v44_v2 = vld [vmem:[%s331_s0] sm:$0xff]  ;;  %v196_v4 = vld [vmem:[%s334_s3 + $0x8] sm:$0xff]  ;;  %s260_s19 = smov [#allocation5]   ;;  %s160_s23 = sshll.u32 %s338_s7, 4  ;;  %s161_s23 = int_to_ptr.hbm [resolvable:$true] %s160_s23 }
   0x8   :  { %v45_v3 = vpack.c.bf16 %v44_v2, %v44_v2  ;;  %114 = vmatpush.bf16.msra.mxu1 %v196_v4  ;;  %v195_v5 = vld [vmem:[%s334_s3] sm:$0xff]  ;;  %s158_s20 = sshll.u32 %s260_s19, 4  ;;  %s159_s20 = int_to_ptr.vmem [resolvable:$true] %s158_s20 }
   0x9   :  { %v202_v6 = vld [vmem:[%s333_s2] ss:$0 sm:$0xff] }
   0xa   :  { %v197_v12 = vld [vmem:[#allocation2] sm:$0xff] }
   0xb   :  { %77 = vmatpush.bf16.msra.mxu0 %v193_v1  ;;  %146 = vmatpush.bf16.msra.mxu2 %v197_v12  ;;  %v203_v13 = vld [vmem:[%s335_s4] ss:$0 sm:$0xff] }
   0xc   :  { %115 = vmatpush.bf16.msra.mxu1 %v195_v5  ;;  %v204_v19 = vld [vmem:[%s337_s6] ss:$0 sm:$0xff] }
   0xe   :  { %178 = vmatmul.msk.bf16.vlgmr.msra.gmra.mxu0 %vm66_vm0, %v45_v3 }
  0x8b   :  { %v79_v7 = vpop.f32.mrf.mxu0 }
  0x8c   :  { %v80_v8 = vadd.f32 %v202_v6, %v79_v7 }
  0x8e   :  { %v83_v9 = vmax.f32 %v80_v8, 0.0 }
  0x90   :  { %v84_v10 = vpack.c.bf16 %v83_v9, %v83_v9 }
  0x92   :  { %187 = vmatmul.msk.bf16.vlgmr.msra.gmra.mxu1 %vm66_vm0, %v84_v10 }
  0x93   :  { %v81_v11 = vpop.f32.mrf.mxu0 }
 0x10f   :  { %v117_v14 = vpop.f32.mrf.mxu1 }
 0x110   :  { %v118_v15 = vadd.f32 %v203_v13, %v117_v14 }
 0x112   :  { %v121_v16 = vmax.f32 %v118_v15, 0.0 }
 0x114   :  { %v122_v17 = vpack.c.bf16 %v121_v16, %v121_v16 }
 0x116   :  { %192 = vmatmul.msk.bf16.vlgmr.msra.gmra.mxu2 %vm135_vm1, %v122_v17 }
 0x117   :  { %v119_v18 = vpop.f32.mrf.mxu1 }
 0x199   :  { %v148_v20 = vpop.f32.mrf.mxu2 }
 0x19a   :  { %v149_v21 = vadd.f32 %v204_v19, %v148_v20 }
 0x19c   :  { %152 = vst.msk [vmem:[#allocation5] sm:$0xff] %vm135_vm1, %v149_v21 }
 0x19d   :  { %163 = dma.vmem_to_hbm [thread:$0]  %s159_s20, 128, %s161_s23, [#allocation4]  }
 0x1a1   :  { %v150_v22 = vpop.f32.mrf.mxu2 }
 0x1a2   :  { %255 = dma.done.wait [#allocation4], 128  }
 0x1a3   :  { %256 = vsyncadd [#allocation4], 4294967168 }
 0x1a4   :  { %168 = vsyncpa [#allocation3], 1 }
 0x1a5   :  { %169 = vsyncpa [#allocation4], 1 }

</bundles_post_ra>
